<compile_context>
chip_gen: v7x
topology: tpu7x:2x2x1
jax: 0.10.0
libtpu: 0.0.40
codegen_flags: <defaults>
</compile_context>

<pallas_src>
import jax
import jax.numpy as jnp
from jax.experimental import pallas as pl
from jax.experimental.pallas import tpu as pltpu

HIDDEN = 32            # hidden_channels
IN_DIM = 5
IN_PAD = 8             # x columns in HBM (5 real + 3 zero)
MID_DIM = 64
OUT_DIM = 30 * 2       # 60
OUT_PAD = 64           # output lanes written to HBM (60 padded to 64)
LANE = 128             # internal padded feature width
MAX_TM = 2048          # max rows per grid step (multiple of 8)
N_HID = 5              # number of stacked 128x128 hidden-layer weights
MIN_SPLIT_ROWS = 512   # force >= 2 grid steps above this many rows (v7x megacore)


def _round_up(a, m):
    return (a + m - 1) // m * m


def _mlp_kernel(x_ref, w1, b1, wh, bh, w5, b5, o_ref):
    """One row-tile of the fused 7-layer MLP.

    x_ref : (TM, 8)        input rows (cols 5..7 are zero), f32
    w1    : (8, 128)       linear1 weight (in,out), bf16, padded (cols>=64 zero)
    b1    : (1, 128)       f32
    wh    : (5, 128, 128)  [linear2, linear3, linear4, conv1, conv2], bf16, padded
    bh    : (5, 1, 128)    f32
    w5    : (128, 64)      linear5 weight, bf16, padded (cols>=60 zero)
    b5    : (1, 64)        f32
    o_ref : (TM, 64)       f32
    """
    f32 = jnp.float32
    bf16 = jnp.bfloat16

    def lin(h, w, b):
        # bf16 MXU matmul, f32 accumulate; bias/relu/residual stay f32.
        return jnp.dot(h.astype(bf16), w, preferred_element_type=f32) + b

    h = jnp.maximum(lin(x_ref[...], w1[...], b1[...]), 0.0)   # linear1 + relu
    h = jnp.maximum(lin(h, wh[0], bh[0]), 0.0)                # linear2 + relu
    h = jnp.maximum(lin(h, wh[1], bh[1]), 0.0) + h            # linear3 + relu + res
    h = jnp.maximum(lin(h, wh[2], bh[2]), 0.0) + h            # linear4 + relu + res
    h = jnp.maximum(lin(h, wh[3], bh[3]), 0.0)                # conv1 + relu
    h = jnp.maximum(lin(h, wh[4], bh[4]), 0.0)                # conv2 + relu
    o_ref[...] = lin(h, w5[...], b5[...])                     # linear5 (no act)


def _pad_wt(w, rows=LANE, cols=LANE):
    """(out,in) torch-layout weight -> (in,out), zero-padded, stored bf16."""
    wt = jnp.asarray(w, jnp.float32).T
    out = jnp.zeros((rows, cols), jnp.float32).at[: wt.shape[0], : wt.shape[1]].set(wt)
    return out.astype(jnp.bfloat16)


def _pad_b(b, cols=LANE):
    return jnp.zeros((1, cols), jnp.float32).at[0, : b.shape[0]].set(
        jnp.asarray(b, jnp.float32))


def _linear_params(key, fan_in, fan_out):
    """Deterministic init mimicking nn.Linear default U(-1/sqrt(fan_in), ...)."""
    kw, kb = jax.random.split(key)
    bound = 1.0 / jnp.sqrt(float(fan_in))
    w = jax.random.uniform(kw, (fan_out, fan_in), jnp.float32, -bound, bound)
    b = jax.random.uniform(kb, (fan_out,), jnp.float32, -bound, bound)
    return w, b


def init_params(seed=0, hidden=HIDDEN):
    key = jax.random.PRNGKey(seed)
    keys = jax.random.split(key, 7)
    p = {}
    p["linear1"] = _linear_params(keys[0], IN_DIM, MID_DIM)
    p["linear2"] = _linear_params(keys[1], MID_DIM, hidden)
    p["linear3"] = _linear_params(keys[2], hidden, hidden)
    p["linear4"] = _linear_params(keys[3], hidden, hidden)
    p["conv1"] = _linear_params(keys[4], hidden, hidden)
    p["conv2"] = _linear_params(keys[5], hidden, hidden)
    p["linear5"] = _linear_params(keys[6], hidden, OUT_DIM)
    return p


@jax.jit
def gnn_mtl_mlp_forward(x, edge_index, params):
    """x: (N, 5) float32; edge_index: (2, E) int32 (unused, matches reference)."""
    del edge_index  # unused by the reference forward pass
    n = x.shape[0]

    # Row tiling: tiles of <= MAX_TM rows.  For n >= MIN_SPLIT_ROWS always use
    # an even number of >= 2 steps so v7x's two TensorCores both get work.
    n_pad8 = _round_up(max(n, 1), 8)
    num_steps = -(-n_pad8 // MAX_TM)
    if num_steps == 1 and n_pad8 >= MIN_SPLIT_ROWS:
        num_steps = 2
    if num_steps > 1 and num_steps % 2 == 1:
        num_steps += 1
    tm = _round_up(-(-n_pad8 // num_steps), 8)
    n_pad = tm * num_steps

    x = jnp.asarray(x, jnp.float32)
    x_rows = jnp.pad(x, ((0, n_pad - n), (0, IN_PAD - IN_DIM)))   # (n_pad, 8)

    # Weights: (out,in) -> (in,out), zero-padded, bf16.  Hidden-layer
    # weights/biases are stacked into single grid-invariant blocks.
    w1p = _pad_wt(params["linear1"][0], rows=IN_PAD, cols=LANE)   # (8, 128) bf16
    b1p = _pad_b(params["linear1"][1])                            # (1, 128) f32
    hid_names = ("linear2", "linear3", "linear4", "conv1", "conv2")
    whp = jnp.stack([_pad_wt(params[k][0]) for k in hid_names])   # (5,128,128) bf16
    bhp = jnp.stack([_pad_b(params[k][1]) for k in hid_names])    # (5,1,128) f32
    w5p = _pad_wt(params["linear5"][0], rows=LANE, cols=OUT_PAD)  # (128, 64) bf16
    b5p = _pad_b(params["linear5"][1], cols=OUT_PAD)              # (1, 64) f32

    out_pad = pl.pallas_call(
        _mlp_kernel,
        out_shape=jax.ShapeDtypeStruct((n_pad, OUT_PAD), jnp.float32),
        grid_spec=pltpu.PrefetchScalarGridSpec(
            num_scalar_prefetch=0,
            grid=(num_steps,),
            in_specs=[
                pl.BlockSpec((tm, IN_PAD), lambda i: (i, 0)),            # x rows
                pl.BlockSpec((IN_PAD, LANE), lambda i: (0, 0)),          # w1
                pl.BlockSpec((1, LANE), lambda i: (0, 0)),               # b1
                pl.BlockSpec((N_HID, LANE, LANE), lambda i: (0, 0, 0)),  # stacked W
                pl.BlockSpec((N_HID, 1, LANE), lambda i: (0, 0, 0)),     # stacked b
                pl.BlockSpec((LANE, OUT_PAD), lambda i: (0, 0)),         # w5
                pl.BlockSpec((1, OUT_PAD), lambda i: (0, 0)),            # b5
            ],
            out_specs=pl.BlockSpec((tm, OUT_PAD), lambda i: (i, 0)),
        ),
        compiler_params=pltpu.CompilerParams(
            dimension_semantics=("parallel",),
            vmem_limit_bytes=32 * 1024 * 1024,
        ),
    )(x_rows, w1p, b1p, whp, bhp, w5p, b5p)

    return out_pad[:n, :OUT_DIM]


def _reference(x, params):
    """Pure-JAX f32 reference of the PyTorch forward, for a sanity check."""
    def lin(name, h):
        w, b = params[name]
        return h @ w.T + b

    h = jax.nn.relu(lin("linear1", x))
    h = jax.nn.relu(lin("linear2", h))
    h = jax.nn.relu(lin("linear3", h)) + h
    h = jax.nn.relu(lin("linear4", h)) + h
    h = jax.nn.relu(lin("conv1", h))
    h = jax.nn.relu(lin("conv2", h))
    return lin("linear5", h)


if __name__ == "__main__":
    key = jax.random.PRNGKey(0)
    kx, ke, kx2 = jax.random.split(key, 3)

    params = init_params(seed=0, hidden=HIDDEN)

    # Small graph-sized input (N=16 nodes): single grid step.
    N, E = 16, 24
    x = jax.random.normal(kx, (N, IN_DIM), jnp.float32)
    edge_index = jax.random.randint(ke, (2, E), 0, N, dtype=jnp.int32)

    out = jax.block_until_ready(gnn_mtl_mlp_forward(x, edge_index, params))
    ref = _reference(x, params)
    assert out.shape == (N, OUT_DIM), out.shape
    # bf16 MXU matmuls: tolerance relaxed versus the pure-f32 version.
    assert jnp.allclose(out, ref, atol=5e-2, rtol=5e-2), (
        float(jnp.max(jnp.abs(out - ref))))

    # Larger N exercises the multi-step pipelined grid + row padding path.
    N2 = 2500
    x2 = jax.random.normal(kx2, (N2, IN_DIM), jnp.float32)
    out2 = jax.block_until_ready(gnn_mtl_mlp_forward(x2, edge_index, params))
    ref2 = _reference(x2, params)
    assert out2.shape == (N2, OUT_DIM), out2.shape
    assert jnp.allclose(out2, ref2, atol=5e-2, rtol=5e-2), (
        float(jnp.max(jnp.abs(out2 - ref2))))

    print("KERNEL_OK")
</pallas_src>

<mosaic_0001>
module attributes {stable_mosaic.version = 11 : i64} {
  func.func @_mlp_kernel(%arg0: i32, %arg1: memref<16x8xf32, #tpu.memory_space<vmem>>, %arg2: memref<8x128xbf16, #tpu.memory_space<vmem>>, %arg3: memref<1x128xf32, #tpu.memory_space<vmem>>, %arg4: memref<5x128x128xbf16, #tpu.memory_space<vmem>>, %arg5: memref<5x1x128xf32, #tpu.memory_space<vmem>>, %arg6: memref<128x64xbf16, #tpu.memory_space<vmem>>, %arg7: memref<1x64xf32, #tpu.memory_space<vmem>>, %arg8: memref<16x64xf32, #tpu.memory_space<vmem>>) attributes {dimension_semantics = [#tpu.dimension_semantics<parallel>], iteration_bounds = array<i64: 1>, scalar_prefetch = 0 : i64, scratch_operands = 0 : i64, tpu.core_type = #tpu.core_type<tc>, window_params = [{transform_indices = @transform_0, window_bounds = array<i64: 16, 8>}, {pipeline_mode = #tpu.pipeline_mode<synchronous>, transform_indices = @transform_1, window_bounds = array<i64: 8, 128>}, {pipeline_mode = #tpu.pipeline_mode<synchronous>, transform_indices = @transform_2, window_bounds = array<i64: 1, 128>}, {pipeline_mode = #tpu.pipeline_mode<synchronous>, transform_indices = @transform_3, window_bounds = array<i64: 5, 128, 128>}, {pipeline_mode = #tpu.pipeline_mode<synchronous>, transform_indices = @transform_4, window_bounds = array<i64: 5, 1, 128>}, {pipeline_mode = #tpu.pipeline_mode<synchronous>, transform_indices = @transform_5, window_bounds = array<i64: 128, 64>}, {pipeline_mode = #tpu.pipeline_mode<synchronous>, transform_indices = @transform_6, window_bounds = array<i64: 1, 64>}, {transform_indices = @transform_7, window_bounds = array<i64: 16, 64>}]} {
    %c0 = arith.constant 0 : index
    %c0_0 = arith.constant 0 : index
    %0 = vector.load %arg1[%c0, %c0_0] : memref<16x8xf32, #tpu.memory_space<vmem>>, vector<16x8xf32>
    %c0_1 = arith.constant 0 : index
    %c0_2 = arith.constant 0 : index
    %1 = vector.load %arg2[%c0_1, %c0_2] : memref<8x128xbf16, #tpu.memory_space<vmem>>, vector<8x128xbf16>
    %c0_3 = arith.constant 0 : index
    %c0_4 = arith.constant 0 : index
    %2 = vector.load %arg3[%c0_3, %c0_4] : memref<1x128xf32, #tpu.memory_space<vmem>>, vector<1x128xf32>
    %3 = arith.truncf %0 : vector<16x8xf32> to vector<16x8xbf16>
    %cst = arith.constant dense<0.000000e+00> : vector<16x128xf32>
    %4 = tpu.matmul %3, %1, %cst {dimension_numbers = #tpu.dot_dimension_numbers<[1], [0], [0], [1], [0, 0, 1, 1], [], []>} : vector<16x8xbf16>, vector<8x128xbf16>, vector<16x128xf32> -> vector<16x128xf32>
    %5 = vector.broadcast %2 : vector<1x128xf32> to vector<16x128xf32>
    %6 = arith.addf %4, %5 : vector<16x128xf32>
    %cst_5 = arith.constant 0.000000e+00 : f32
    %7 = vector.broadcast %cst_5 : f32 to vector<16x128xf32>
    %8 = arith.maximumf %6, %7 : vector<16x128xf32>
    %c0_6 = arith.constant 0 : index
    %c0_7 = arith.constant 0 : index
    %c0_8 = arith.constant 0 : index
    %9 = vector.load %arg4[%c0_6, %c0_7, %c0_8] : memref<5x128x128xbf16, #tpu.memory_space<vmem>>, vector<1x128x128xbf16>
    %10 = vector.shape_cast %9 : vector<1x128x128xbf16> to vector<128x128xbf16>
    %c0_9 = arith.constant 0 : index
    %c0_10 = arith.constant 0 : index
    %c0_11 = arith.constant 0 : index
    %11 = vector.load %arg5[%c0_9, %c0_10, %c0_11] : memref<5x1x128xf32, #tpu.memory_space<vmem>>, vector<1x1x128xf32>
    %12 = vector.shape_cast %11 : vector<1x1x128xf32> to vector<1x128xf32>
    %13 = arith.truncf %8 : vector<16x128xf32> to vector<16x128xbf16>
    %cst_12 = arith.constant dense<0.000000e+00> : vector<16x128xf32>
    %14 = tpu.matmul %13, %10, %cst_12 {dimension_numbers = #tpu.dot_dimension_numbers<[1], [0], [0], [1], [0, 0, 1, 1], [], []>} : vector<16x128xbf16>, vector<128x128xbf16>, vector<16x128xf32> -> vector<16x128xf32>
    %15 = vector.broadcast %12 : vector<1x128xf32> to vector<16x128xf32>
    %16 = arith.addf %14, %15 : vector<16x128xf32>
    %cst_13 = arith.constant 0.000000e+00 : f32
    %17 = vector.broadcast %cst_13 : f32 to vector<16x128xf32>
    %18 = arith.maximumf %16, %17 : vector<16x128xf32>
    %c1 = arith.constant 1 : index
    %c0_14 = arith.constant 0 : index
    %c0_15 = arith.constant 0 : index
    %19 = vector.load %arg4[%c1, %c0_14, %c0_15] : memref<5x128x128xbf16, #tpu.memory_space<vmem>>, vector<1x128x128xbf16>
    %20 = vector.shape_cast %19 : vector<1x128x128xbf16> to vector<128x128xbf16>
    %c1_16 = arith.constant 1 : index
    %c0_17 = arith.constant 0 : index
    %c0_18 = arith.constant 0 : index
    %21 = vector.load %arg5[%c1_16, %c0_17, %c0_18] : memref<5x1x128xf32, #tpu.memory_space<vmem>>, vector<1x1x128xf32>
    %22 = vector.shape_cast %21 : vector<1x1x128xf32> to vector<1x128xf32>
    %23 = arith.truncf %18 : vector<16x128xf32> to vector<16x128xbf16>
    %cst_19 = arith.constant dense<0.000000e+00> : vector<16x128xf32>
    %24 = tpu.matmul %23, %20, %cst_19 {dimension_numbers = #tpu.dot_dimension_numbers<[1], [0], [0], [1], [0, 0, 1, 1], [], []>} : vector<16x128xbf16>, vector<128x128xbf16>, vector<16x128xf32> -> vector<16x128xf32>
    %25 = vector.broadcast %22 : vector<1x128xf32> to vector<16x128xf32>
    %26 = arith.addf %24, %25 : vector<16x128xf32>
    %cst_20 = arith.constant 0.000000e+00 : f32
    %27 = vector.broadcast %cst_20 : f32 to vector<16x128xf32>
    %28 = arith.maximumf %26, %27 : vector<16x128xf32>
    %29 = arith.addf %28, %18 : vector<16x128xf32>
    %c2 = arith.constant 2 : index
    %c0_21 = arith.constant 0 : index
    %c0_22 = arith.constant 0 : index
    %30 = vector.load %arg4[%c2, %c0_21, %c0_22] : memref<5x128x128xbf16, #tpu.memory_space<vmem>>, vector<1x128x128xbf16>
    %31 = vector.shape_cast %30 : vector<1x128x128xbf16> to vector<128x128xbf16>
    %c2_23 = arith.constant 2 : index
    %c0_24 = arith.constant 0 : index
    %c0_25 = arith.constant 0 : index
    %32 = vector.load %arg5[%c2_23, %c0_24, %c0_25] : memref<5x1x128xf32, #tpu.memory_space<vmem>>, vector<1x1x128xf32>
    %33 = vector.shape_cast %32 : vector<1x1x128xf32> to vector<1x128xf32>
    %34 = arith.truncf %29 : vector<16x128xf32> to vector<16x128xbf16>
    %cst_26 = arith.constant dense<0.000000e+00> : vector<16x128xf32>
    %35 = tpu.matmul %34, %31, %cst_26 {dimension_numbers = #tpu.dot_dimension_numbers<[1], [0], [0], [1], [0, 0, 1, 1], [], []>} : vector<16x128xbf16>, vector<128x128xbf16>, vector<16x128xf32> -> vector<16x128xf32>
    %36 = vector.broadcast %33 : vector<1x128xf32> to vector<16x128xf32>
    %37 = arith.addf %35, %36 : vector<16x128xf32>
    %cst_27 = arith.constant 0.000000e+00 : f32
    %38 = vector.broadcast %cst_27 : f32 to vector<16x128xf32>
    %39 = arith.maximumf %37, %38 : vector<16x128xf32>
    %40 = arith.addf %39, %29 : vector<16x128xf32>
    %c3 = arith.constant 3 : index
    %c0_28 = arith.constant 0 : index
    %c0_29 = arith.constant 0 : index
    %41 = vector.load %arg4[%c3, %c0_28, %c0_29] : memref<5x128x128xbf16, #tpu.memory_space<vmem>>, vector<1x128x128xbf16>
    %42 = vector.shape_cast %41 : vector<1x128x128xbf16> to vector<128x128xbf16>
    %c3_30 = arith.constant 3 : index
    %c0_31 = arith.constant 0 : index
    %c0_32 = arith.constant 0 : index
    %43 = vector.load %arg5[%c3_30, %c0_31, %c0_32] : memref<5x1x128xf32, #tpu.memory_space<vmem>>, vector<1x1x128xf32>
    %44 = vector.shape_cast %43 : vector<1x1x128xf32> to vector<1x128xf32>
    %45 = arith.truncf %40 : vector<16x128xf32> to vector<16x128xbf16>
    %cst_33 = arith.constant dense<0.000000e+00> : vector<16x128xf32>
    %46 = tpu.matmul %45, %42, %cst_33 {dimension_numbers = #tpu.dot_dimension_numbers<[1], [0], [0], [1], [0, 0, 1, 1], [], []>} : vector<16x128xbf16>, vector<128x128xbf16>, vector<16x128xf32> -> vector<16x128xf32>
    %47 = vector.broadcast %44 : vector<1x128xf32> to vector<16x128xf32>
    %48 = arith.addf %46, %47 : vector<16x128xf32>
    %cst_34 = arith.constant 0.000000e+00 : f32
    %49 = vector.broadcast %cst_34 : f32 to vector<16x128xf32>
    %50 = arith.maximumf %48, %49 : vector<16x128xf32>
    %c4 = arith.constant 4 : index
    %c0_35 = arith.constant 0 : index
    %c0_36 = arith.constant 0 : index
    %51 = vector.load %arg4[%c4, %c0_35, %c0_36] : memref<5x128x128xbf16, #tpu.memory_space<vmem>>, vector<1x128x128xbf16>
    %52 = vector.shape_cast %51 : vector<1x128x128xbf16> to vector<128x128xbf16>
    %c4_37 = arith.constant 4 : index
    %c0_38 = arith.constant 0 : index
    %c0_39 = arith.constant 0 : index
    %53 = vector.load %arg5[%c4_37, %c0_38, %c0_39] : memref<5x1x128xf32, #tpu.memory_space<vmem>>, vector<1x1x128xf32>
    %54 = vector.shape_cast %53 : vector<1x1x128xf32> to vector<1x128xf32>
    %55 = arith.truncf %50 : vector<16x128xf32> to vector<16x128xbf16>
    %cst_40 = arith.constant dense<0.000000e+00> : vector<16x128xf32>
    %56 = tpu.matmul %55, %52, %cst_40 {dimension_numbers = #tpu.dot_dimension_numbers<[1], [0], [0], [1], [0, 0, 1, 1], [], []>} : vector<16x128xbf16>, vector<128x128xbf16>, vector<16x128xf32> -> vector<16x128xf32>
    %57 = vector.broadcast %54 : vector<1x128xf32> to vector<16x128xf32>
    %58 = arith.addf %56, %57 : vector<16x128xf32>
    %cst_41 = arith.constant 0.000000e+00 : f32
    %59 = vector.broadcast %cst_41 : f32 to vector<16x128xf32>
    %60 = arith.maximumf %58, %59 : vector<16x128xf32>
    %c0_42 = arith.constant 0 : index
    %c0_43 = arith.constant 0 : index
    %61 = vector.load %arg6[%c0_42, %c0_43] : memref<128x64xbf16, #tpu.memory_space<vmem>>, vector<128x64xbf16>
    %c0_44 = arith.constant 0 : index
    %c0_45 = arith.constant 0 : index
    %62 = vector.load %arg7[%c0_44, %c0_45] : memref<1x64xf32, #tpu.memory_space<vmem>>, vector<1x64xf32>
    %63 = arith.truncf %60 : vector<16x128xf32> to vector<16x128xbf16>
    %cst_46 = arith.constant dense<0.000000e+00> : vector<16x64xf32>
    %64 = tpu.matmul %63, %61, %cst_46 {dimension_numbers = #tpu.dot_dimension_numbers<[1], [0], [0], [1], [0, 0, 1, 1], [], []>} : vector<16x128xbf16>, vector<128x64xbf16>, vector<16x64xf32> -> vector<16x64xf32>
    %65 = vector.broadcast %62 : vector<1x64xf32> to vector<16x64xf32>
    %66 = arith.addf %64, %65 : vector<16x64xf32>
    %c0_47 = arith.constant 0 : index
    %c0_48 = arith.constant 0 : index
    %67 = vector.load %arg8[%c0_47, %c0_48] : memref<16x64xf32, #tpu.memory_space<vmem>>, vector<16x64xf32>
    tpu.vector_store %arg8[%c0_47, %c0_48], %66 {strides = array<i32>} : memref<16x64xf32, #tpu.memory_space<vmem>>, vector<16x64xf32>,
    return
  }
  func.func @transform_0(%arg0: i32) -> (i32, i32) {
    %c0_i32 = arith.constant 0 : i32
    %c0_i32_0 = arith.constant 0 : i32
    return %arg0, %c0_i32 : i32, i32
  }
  func.func @transform_1(%arg0: i32) -> (i32, i32) {
    %c0_i32 = arith.constant 0 : i32
    %c0_i32_0 = arith.constant 0 : i32
    %c0_i32_1 = arith.constant 0 : i32
    return %c0_i32, %c0_i32_0 : i32, i32
  }
  func.func @transform_2(%arg0: i32) -> (i32, i32) {
    %c0_i32 = arith.constant 0 : i32
    %c0_i32_0 = arith.constant 0 : i32
    %c0_i32_1 = arith.constant 0 : i32
    return %c0_i32, %c0_i32_0 : i32, i32
  }
  func.func @transform_3(%arg0: i32) -> (i32, i32, i32) {
    %c0_i32 = arith.constant 0 : i32
    %c0_i32_0 = arith.constant 0 : i32
    %c0_i32_1 = arith.constant 0 : i32
    %c0_i32_2 = arith.constant 0 : i32
    return %c0_i32, %c0_i32_0, %c0_i32_1 : i32, i32, i32
  }
  func.func @transform_4(%arg0: i32) -> (i32, i32, i32) {
    %c0_i32 = arith.constant 0 : i32
    %c0_i32_0 = arith.constant 0 : i32
    %c0_i32_1 = arith.constant 0 : i32
    %c0_i32_2 = arith.constant 0 : i32
    return %c0_i32, %c0_i32_0, %c0_i32_1 : i32, i32, i32
  }
  func.func @transform_5(%arg0: i32) -> (i32, i32) {
    %c0_i32 = arith.constant 0 : i32
    %c0_i32_0 = arith.constant 0 : i32
    %c0_i32_1 = arith.constant 0 : i32
    return %c0_i32, %c0_i32_0 : i32, i32
  }
  func.func @transform_6(%arg0: i32) -> (i32, i32) {
    %c0_i32 = arith.constant 0 : i32
    %c0_i32_0 = arith.constant 0 : i32
    %c0_i32_1 = arith.constant 0 : i32
    return %c0_i32, %c0_i32_0 : i32, i32
  }
  func.func @transform_7(%arg0: i32) -> (i32, i32) {
    %c0_i32 = arith.constant 0 : i32
    %c0_i32_0 = arith.constant 0 : i32
    return %arg0, %c0_i32 : i32, i32
  }
}

</mosaic_0001>

<bundles_post_ra>
// kernel: gnn_mtl_mlp_forward.1
= control target key start
LH: loop header
LB: loop body
LE: loop exit
PB: predicated region body
PF: predicated region fallthrough
CT: control target
= control target key end

     0   :  { %vm43_vm0 = vcmask 1043456   ;;  %v1192_v2 = vmov 0.0   ;;  %vm1193_vm1 = vmmov 0   ;;  %vm39_vm2 = vcmask 64512   ;;  %s1486_s0 = inlined_call_operand.vmem [shape: f32[16,8], index: 0, kind: input, shape index: {}]   ;;  %s1487_s1 = inlined_call_operand.vmem [shape: bf16[8,128], index: 1, kind: input, shape index: {}]   ;;  %s1488_s2 = inlined_call_operand.vmem [shape: f32[1,128], index: 2, kind: input, shape index: {}]   ;;  %s1489_s3 = inlined_call_operand.vmem [shape: bf16[5,128,128], index: 3, kind: input, shape index: {}]   ;;  %s1490_s4 = inlined_call_operand.vmem [shape: f32[5,1,128], index: 4, kind: input, shape index: {}]   ;;  %s1491_s5 = inlined_call_operand.vmem [shape: bf16[128,64], index: 5, kind: input, shape index: {}]   ;;  %s1492_s6 = inlined_call_operand.vmem [shape: f32[1,64], index: 6, kind: input, shape index: {}]   ;;  %s1493_s7 = inlined_call_operand.hbm [shape: f32[16,64], index: 7, kind: output, shape index: {}]  }
   0x1   :  { %v30_v0 = vld [vmem:[%s1487_s1] sm:$0xf]  ;;  %989 = vmatprep.subr.bf16.mxu0 %v1192_v2  ;;  %991 = vmatprep.mubr.msk.bf16.mxu0 %vm1193_vm1, %v1192_v2  ;;  %v29_v4 = vld [vmem:[%s1486_s0 + $0x8] sm:$0xff]  ;;  %v1122_v8 = vld [vmem:[%s1489_s3 + $0x10] sm:$0xff]  }
   0x2   :  { %v28_v1 = vld [vmem:[%s1486_s0] sm:$0xff]  ;;  %v45_v3 = vsel %vm43_vm0, %v30_v0, 0  ;;  %995 = vmatprep.subr.bf16.mxu1 %v1192_v2  ;;  %v1121_v7 = vld [vmem:[%s1489_s3 + $0x8] sm:$0xff]   ;;  %1011 = vmatprep.mubr.msk.bf16.mxu1 %vm1193_vm1, %v1192_v2  ;;  %v1123_v9 = vld [vmem:[%s1489_s3 + $0x18] sm:$0xff]  }
   0x3   :  { %v1120_v5 = vld [vmem:[%s1489_s3] sm:$0xff]   ;;  %990 = vmatpush3.bf16.msra.mxu0 %v45_v3  ;;  %v32_v6 = vpack.c.bf16 %v29_v4, %v28_v1  ;;  %v1125_v11 = vld [vmem:[%s1489_s3 + $0x28] sm:$0xff]  }
   0x4   :  { %996 = vmatpush3.bf16.msra.mxu1 %v1120_v5  ;;  %1015 = vmatprep.subr.bf16.mxu0 %v1192_v2  ;;  %v1124_v10 = vld [vmem:[%s1489_s3 + $0x20] sm:$0xff]  }
   0x5   :  { %997 = vmatprep.subr.bf16.mxu1 %v1192_v2 }
   0x6   :  { %992 = vmatmul.mubr.msk.bf16.vlgmr.msra.gmra.mrb[0].mxu0 %vm39_vm2, %v32_v6 }
   0x7   :  { %1031 = vmatprep.mubr.msk.bf16.mxu0 %vm1193_vm1, %v1192_v2 }
   0x8   :  { %998 = vmatpush3.bf16.msra.mxu1 %v1121_v7 }
   0x9   :  { %999 = vmatprep.subr.bf16.mxu1 %v1192_v2 }
   0xc   :  { %1000 = vmatpush3.bf16.msra.mxu1 %v1122_v8 }
   0xd   :  { %1001 = vmatprep.subr.bf16.mxu1 %v1192_v2 }
  0x10   :  { %1002 = vmatpush3.bf16.msra.mxu1 %v1123_v9 }
  0x11   :  { %1003 = vmatprep.subr.bf16.mxu1 %v1192_v2 }
  0x14   :  { %1004 = vmatpush3.bf16.msra.mxu1 %v1124_v10 }
  0x15   :  { %1005 = vmatprep.subr.bf16.mxu1 %v1192_v2 }
  0x18   :  { %1006 = vmatpush3.bf16.msra.mxu1 %v1125_v11 }
  0x19   :  { %1007 = vmatprep.subr.bf16.mxu1 %v1192_v2 }
  0x1a   :  { %12 = vsyncpa [#allocation3], 0  ;;  %v1126_v12 = vld [vmem:[%s1489_s3 + $0x30] sm:$0xff]   ;;  %v1127_v13 = vld [vmem:[%s1489_s3 + $0x38] sm:$0xff]   ;;  %vm790_vm3 = vcmask 523264  }
  0x1b   :  { %v1128_v14 = vld [vmem:[%s1489_s3 + $0x40] sm:$0xff]   ;;  %v1129_v15 = vld [vmem:[%s1489_s3 + $0x48] sm:$0xff]   ;;  %v1130_v16 = vld [vmem:[%s1489_s3 + $0x50] sm:$0xff]  }
  0x1c   :  { %1008 = vmatpush3.bf16.msra.mxu1 %v1126_v12  ;;  %1016 = vmatpush3.bf16.msra.mxu0 %v1128_v14  ;;  %v1131_v17 = vld [vmem:[%s1489_s3 + $0x58] sm:$0xff]   ;;  %v1132_v18 = vld [vmem:[%s1489_s3 + $0x60] sm:$0xff]   ;;  %v1133_v19 = vld [vmem:[%s1489_s3 + $0x68] sm:$0xff]  }
  0x1d   :  { %1009 = vmatprep.subr.bf16.mxu1 %v1192_v2  ;;  %1017 = vmatprep.subr.bf16.mxu0 %v1192_v2  ;;  %v809_v20 = vld [vmem:[%s1488_s2] ss:$0 sm:$0xff]  ;;  %v1134_v30 = vld [vmem:[%s1489_s3 + $0x70] sm:$0xff]   ;;  %v1135_v31 = vld [vmem:[%s1489_s3 + $0x78] sm:$0xff]  }
  0x1e   :  { %v1136_v32 = vld [vmem:[%s1489_s3 + $0x80] sm:$0xff]   ;;  %v1137_v33 = vld [vmem:[%s1489_s3 + $0x88] sm:$0xff]   ;;  %v1138_v34 = vld [vmem:[%s1489_s3 + $0x90] sm:$0xff]  }
  0x1f   :  { %v1139_v35 = vld [vmem:[%s1489_s3 + $0x98] sm:$0xff]   ;;  %v1140_v36 = vld [vmem:[%s1489_s3 + $0xa0] sm:$0xff]   ;;  %v1141_v47 = vld [vmem:[%s1489_s3 + $0xa8] sm:$0xff]  }
  0x20   :  { %1010 = vmatpush3.bf16.msra.mxu1 %v1127_v13  ;;  %1018 = vmatpush3.bf16.msra.mxu0 %v1129_v15  ;;  %v811_v37 = vld [vmem:[%s1490_s4] ss:$0 sm:$0xff]  ;;  %v1142_v48 = vld [vmem:[%s1489_s3 + $0xb0] sm:$0xff]   ;;  %v1143_v49 = vld [vmem:[%s1489_s3 + $0xb8] sm:$0xff]  }
  0x21   :  { %1035 = vmatprep.subr.bf16.mxu1 %v1192_v2  ;;  %1019 = vmatprep.subr.bf16.mxu0 %v1192_v2  ;;  %v1144_v50 = vld [vmem:[%s1489_s3 + $0xc0] sm:$0xff]   ;;  %v1145_v51 = vld [vmem:[%s1489_s3 + $0xc8] sm:$0xff]   ;;  %v1146_v52 = vld [vmem:[%s1489_s3 + $0xd0] sm:$0xff]  }
  0x22   :  { %v1147_v53 = vld [vmem:[%s1489_s3 + $0xd8] sm:$0xff]   ;;  %v1148_v54 = vld [vmem:[%s1489_s3 + $0xe0] sm:$0xff]   ;;  %v1149_v4 = vld [vmem:[%s1489_s3 + $0xe8] sm:$0xff]  }
  0x23   :  { %v837_v55 = vld [vmem:[%s1490_s4 + $0x1] ss:$0 sm:$0xff]  ;;  %v1150_v5 = vld [vmem:[%s1489_s3 + $0xf0] sm:$0xff]   ;;  %v1151_v6 = vld [vmem:[%s1489_s3 + $0xf8] sm:$0xff]  }
  0x24   :  { %1020 = vmatpush3.bf16.msra.mxu0 %v1130_v16  ;;  %v1152_v7 = vld [vmem:[%s1489_s3 + $0x100] sm:$0xff]   ;;  %v1153_v8 = vld [vmem:[%s1489_s3 + $0x108] sm:$0xff]   ;;  %v1154_v9 = vld [vmem:[%s1489_s3 + $0x110] sm:$0xff]  }
  0x25   :  { %1021 = vmatprep.subr.bf16.mxu0 %v1192_v2  ;;  %v1155_v10 = vld [vmem:[%s1489_s3 + $0x118] sm:$0xff]   ;;  %v1156_v11 = vld [vmem:[%s1489_s3 + $0x120] sm:$0xff]   ;;  %v1157_v12 = vld [vmem:[%s1489_s3 + $0x128] sm:$0xff]  }
  0x26   :  { %v863_v13 = vld [vmem:[%s1490_s4 + $0x2] ss:$0 sm:$0xff] }
  0x28   :  { %1022 = vmatpush3.bf16.msra.mxu0 %v1131_v17 }
  0x29   :  { %1023 = vmatprep.subr.bf16.mxu0 %v1192_v2 }
  0x2c   :  { %1024 = vmatpush3.bf16.msra.mxu0 %v1132_v18 }
  0x2d   :  { %1025 = vmatprep.subr.bf16.mxu0 %v1192_v2 }
  0x30   :  { %1026 = vmatpush3.bf16.msra.mxu0 %v1133_v19 }
  0x31   :  { %1027 = vmatprep.subr.bf16.mxu0 %v1192_v2 }
  0x34   :  { %1028 = vmatpush3.bf16.msra.mxu0 %v1134_v30  ;;  %v1163_v30 = vld [vmem:[%s1491_s5 + $0x18] sm:$0xff]  }
  0x35   :  { %1029 = vmatprep.subr.bf16.mxu0 %v1192_v2 }
  0x38   :  { %1030 = vmatpush3.bf16.msra.mxu0 %v1135_v31  ;;  %v1164_v31 = vld [vmem:[%s1491_s5 + $0x20] sm:$0xff]  }
  0x39   :  { %1055 = vmatprep.subr.bf16.mxu0 %v1192_v2 }
  0xd9   :  { %v81_v21 = vpop.f32.mrb[0].mxu0 }
  0xda   :  { %v82_v22 = vadd.f32 %v809_v20, %v81_v21  ;;  %v993_v23 = vpop.f32.mrb[1].mxu0 }
  0xdb   :  { %v84_v24 = vpop.f32.mrb[2].mxu0 }
  0xdc   :  { %v85_v25 = vadd.f32 %v809_v20, %v84_v24  ;;  %v994_v26 = vpop.f32.mrb[3].mxu0  ;;  %v88_v27 = vmax.f32 %v82_v22, 0.0 }
  0xdd   :  { %v1159_v26 = vld [vmem:[%s1489_s3 + $0x138] sm:$0xff]  }
  0xde   :  { %v89_v28 = vmax.f32 %v85_v25, 0.0  ;;  %v1158_v25 = vld [vmem:[%s1489_s3 + $0x130] sm:$0xff]  }
  0xe0   :  { %v107_v29 = vpack.c.bf16 %v89_v28, %v88_v27  ;;  %v1160_v27 = vld [vmem:[%s1491_s5] sm:$0xff]   ;;  %v1161_v28 = vld [vmem:[%s1491_s5 + $0x8] sm:$0xff]  }
  0xe2   :  { %1012 = vmatmul.mubr.bf16.vlgmr.msra.gmra.mrb[0].mxu1 %v107_v29  ;;  %v1162_v29 = vld [vmem:[%s1491_s5 + $0x10] sm:$0xff]  }
  0xe3   :  { %1051 = vmatprep.mubr.msk.bf16.mxu1 %vm1193_vm1, %v1192_v2  ;;  %1036 = vmatpush3.bf16.msra.mxu1 %v1136_v32  ;;  %v1165_v32 = vld [vmem:[%s1491_s5 + $0x28] sm:$0xff]  }
  0xe4   :  { %1037 = vmatprep.subr.bf16.mxu1 %v1192_v2 }
  0xe7   :  { %1038 = vmatpush3.bf16.msra.mxu1 %v1137_v33  ;;  %v889_v33 = vld [vmem:[%s1490_s4 + $0x3] ss:$0 sm:$0xff] }
  0xe8   :  { %1039 = vmatprep.subr.bf16.mxu1 %v1192_v2 }
  0xeb   :  { %1040 = vmatpush3.bf16.msra.mxu1 %v1138_v34 }
  0xec   :  { %1041 = vmatprep.subr.bf16.mxu1 %v1192_v2 }
  0xef   :  { %1042 = vmatpush3.bf16.msra.mxu1 %v1139_v35 }
  0xf0   :  { %1043 = vmatprep.subr.bf16.mxu1 %v1192_v2 }
  0xf3   :  { %1044 = vmatpush3.bf16.msra.mxu1 %v1140_v36 }
  0xf4   :  { %1045 = vmatprep.subr.bf16.mxu1 %v1192_v2 }
  0xf7   :  { %1046 = vmatpush3.bf16.msra.mxu1 %v1141_v47 }
  0xf8   :  { %1047 = vmatprep.subr.bf16.mxu1 %v1192_v2 }
  0xfb   :  { %1048 = vmatpush3.bf16.msra.mxu1 %v1142_v48 }
  0xfc   :  { %1049 = vmatprep.subr.bf16.mxu1 %v1192_v2 }
  0xff   :  { %1050 = vmatpush3.bf16.msra.mxu1 %v1143_v49 }
 0x100   :  { %1075 = vmatprep.subr.bf16.mxu1 %v1192_v2 }
 0x1b5   :  { %v196_v38 = vpop.f32.mrb[0].mxu1 }
 0x1b6   :  { %v197_v39 = vadd.f32 %v811_v37, %v196_v38  ;;  %v1013_v40 = vpop.f32.mrb[1].mxu1 }
 0x1b7   :  { %v199_v41 = vpop.f32.mrb[2].mxu1 }
 0x1b8   :  { %v200_v42 = vadd.f32 %v811_v37, %v199_v41  ;;  %v1014_v43 = vpop.f32.mrb[3].mxu1  ;;  %v203_v44 = vmax.f32 %v197_v39, 0.0 }
 0x1b9   :  { %v1166_v43 = vld [vmem:[%s1491_s5 + $0x30] sm:$0xff]  }
 0x1ba   :  { %v204_v45 = vmax.f32 %v200_v42, 0.0 }
 0x1bc   :  { %v224_v46 = vpack.c.bf16 %v204_v45, %v203_v44 }
 0x1be   :  { %1032 = vmatmul.mubr.bf16.vlgmr.msra.gmra.mrb[4].mxu0 %v224_v46 }
 0x1bf   :  { %1071 = vmatprep.mubr.msk.bf16.mxu0 %vm1193_vm1, %v1192_v2  ;;  %1056 = vmatpush3.bf16.msra.mxu0 %v1144_v50 }
 0x1c0   :  { %1057 = vmatprep.subr.bf16.mxu0 %v1192_v2 }
 0x1c3   :  { %1058 = vmatpush3.bf16.msra.mxu0 %v1145_v51 }
 0x1c4   :  { %1059 = vmatprep.subr.bf16.mxu0 %v1192_v2 }
 0x1c7   :  { %1060 = vmatpush3.bf16.msra.mxu0 %v1146_v52 }
 0x1c8   :  { %1061 = vmatprep.subr.bf16.mxu0 %v1192_v2 }
 0x1cb   :  { %1062 = vmatpush3.bf16.msra.mxu0 %v1147_v53 }
 0x1cc   :  { %1063 = vmatprep.subr.bf16.mxu0 %v1192_v2 }
 0x1cf   :  { %1064 = vmatpush3.bf16.msra.mxu0 %v1148_v54 }
 0x1d0   :  { %1065 = vmatprep.subr.bf16.mxu0 %v1192_v2 }
 0x1d3   :  { %1066 = vmatpush3.bf16.msra.mxu0 %v1149_v4 }
 0x1d4   :  { %1067 = vmatprep.subr.bf16.mxu0 %v1192_v2 }
 0x1d7   :  { %1068 = vmatpush3.bf16.msra.mxu0 %v1150_v5 }
 0x1d8   :  { %1069 = vmatprep.subr.bf16.mxu0 %v1192_v2 }
 0x1db   :  { %1070 = vmatpush3.bf16.msra.mxu0 %v1151_v6 }
 0x1dc   :  { %1095 = vmatprep.subr.bf16.mxu0 %v1192_v2 }
 0x291   :  { %v313_v56 = vpop.f32.mrb[4].mxu0 }
 0x292   :  { %v314_v57 = vadd.f32 %v837_v55, %v313_v56  ;;  %v1033_v58 = vpop.f32.mrb[5].mxu0 }
 0x293   :  { %v316_v59 = vpop.f32.mrb[6].mxu0 }
 0x294   :  { %v320_v60 = vmax.f32 %v314_v57, 0.0  ;;  %v317_v61 = vadd.f32 %v837_v55, %v316_v59  ;;  %v1034_v62 = vpop.f32.mrb[7].mxu0 }
 0x296   :  { %v321_v63 = vmax.f32 %v317_v61, 0.0  ;;  %v322_v0 = vadd.f32 %v320_v60, %v203_v44  ;;  %v1167_v44 = vld [vmem:[%s1491_s5 + $0x38] sm:$0xff]   ;;  %s1194_s5 = smov [#allocation2]  }
 0x297   :  { %s798_s11 = sshll.u32 %s1194_s5, 4  ;;  %s799_s11 = int_to_ptr.vmem [resolvable:$true] %s798_s11 }
 0x298   :  { %v323_v1 = vadd.f32 %v321_v63, %v204_v45  ;;  %v915_v45 = vld [vmem:[%s1490_s4 + $0x4] ss:$0 sm:$0xff]  ;;  %s1168_s4 = scalar_lea.vmem %s799_s11, 256  ;;  %p1173_p1 = scmp.lt.s32.totalorder %s799_s11, %s799_s11 }
 0x299   :  { %p1169_p0 = scmp.ne.s32.totalorder %s799_s11, %s1168_s4  ;;  %p1174_p2 = scmp.lt.s32.totalorder %s1168_s4, %s1168_s4 }
 0x29a   :  { %v343_v3 = vpack.c.bf16 %v323_v1, %v322_v0 }
 0x29b   :  { %p1175_p3 = por %p1174_p2, %p1173_p1 }
 0x29c   :  { %1052 = vmatmul.mubr.bf16.vlgmr.msra.gmra.mrb[4].mxu1 %v343_v3 }
 0x29d   :  { %1091 = vmatprep.mubr.msk.bf16.mxu1 %vm1193_vm1, %v1192_v2  ;;  %1076 = vmatpush3.bf16.msra.mxu1 %v1152_v7  ;;  %p1176_p4 = pnand %p1175_p3, %p1169_p0 }
 0x29e   :  { %1077 = vmatprep.subr.bf16.mxu1 %v1192_v2 }
 0x2a1   :  { %1078 = vmatpush3.bf16.msra.mxu1 %v1153_v8 }
 0x2a2   :  { %1079 = vmatprep.subr.bf16.mxu1 %v1192_v2 }
 0x2a5   :  { %1080 = vmatpush3.bf16.msra.mxu1 %v1154_v9 }
 0x2a6   :  { %1081 = vmatprep.subr.bf16.mxu1 %v1192_v2 }
 0x2a9   :  { %1082 = vmatpush3.bf16.msra.mxu1 %v1155_v10 }
 0x2aa   :  { %1083 = vmatprep.subr.bf16.mxu1 %v1192_v2 }
 0x2ad   :  { %1084 = vmatpush3.bf16.msra.mxu1 %v1156_v11 }
 0x2ae   :  { %1085 = vmatprep.subr.bf16.mxu1 %v1192_v2 }
 0x2b1   :  { %1086 = vmatpush3.bf16.msra.mxu1 %v1157_v12 }
 0x2b2   :  { %1087 = vmatprep.subr.bf16.mxu1 %v1192_v2 }
 0x2b5   :  { %1088 = vmatpush3.bf16.msra.mxu1 %v1158_v25 }
 0x2b6   :  { %1089 = vmatprep.subr.bf16.mxu1 %v1192_v2 }
 0x2b9   :  { %1090 = vmatpush3.bf16.msra.mxu1 %v1159_v26 }
 0x36f   :  { %v432_v14 = vpop.f32.mrb[4].mxu1 }
 0x370   :  { %v433_v15 = vadd.f32 %v863_v13, %v432_v14  ;;  %v1053_v16 = vpop.f32.mrb[5].mxu1 }
 0x371   :  { %v435_v17 = vpop.f32.mrb[6].mxu1 }
 0x372   :  { %v439_v18 = vmax.f32 %v433_v15, 0.0  ;;  %v436_v19 = vadd.f32 %v863_v13, %v435_v17  ;;  %v1054_v20 = vpop.f32.mrb[7].mxu1 }
 0x374   :  { %v440_v21 = vmax.f32 %v436_v19, 0.0  ;;  %v441_v22 = vadd.f32 %v439_v18, %v322_v0 }
 0x376   :  { %v442_v23 = vadd.f32 %v440_v21, %v323_v1 }
 0x378   :  { %v462_v24 = vpack.c.bf16 %v442_v23, %v441_v22 }
 0x37a   :  { %1072 = vmatmul.mubr.bf16.vlgmr.msra.gmra.mrb[8].mxu0 %v462_v24 }
 0x37b   :  { %1111 = vmatprep.mubr.msk.bf16.mxu0 %vm1193_vm1, %v1192_v2  ;;  %1096 = vmatpush3.bf16.msra.mxu0 %v1160_v27 }
 0x37c   :  { %1097 = vmatprep.subr.bf16.mxu0 %v1192_v2 }
 0x37f   :  { %1098 = vmatpush3.bf16.msra.mxu0 %v1161_v28 }
 0x380   :  { %1099 = vmatprep.subr.bf16.mxu0 %v1192_v2 }
 0x383   :  { %1100 = vmatpush3.bf16.msra.mxu0 %v1162_v29 }
 0x384   :  { %1101 = vmatprep.subr.bf16.mxu0 %v1192_v2 }
 0x387   :  { %1102 = vmatpush3.bf16.msra.mxu0 %v1163_v30 }
 0x388   :  { %1103 = vmatprep.subr.bf16.mxu0 %v1192_v2 }
 0x38b   :  { %1104 = vmatpush3.bf16.msra.mxu0 %v1164_v31 }
 0x38c   :  { %1105 = vmatprep.subr.bf16.mxu0 %v1192_v2 }
 0x38f   :  { %1106 = vmatpush3.bf16.msra.mxu0 %v1165_v32 }
 0x390   :  { %1107 = vmatprep.subr.bf16.mxu0 %v1192_v2 }
 0x393   :  { %1108 = vmatpush3.bf16.msra.mxu0 %v1166_v43 }
 0x394   :  { %1109 = vmatprep.subr.bf16.mxu0 %v1192_v2  ;;  %v924_v2 = vld [vmem:[%s1492_s6] ss:$0 sm:$0xff] }
 0x397   :  { %1110 = vmatpush3.bf16.msra.mxu0 %v1167_v44 }
 0x44d   :  { %v551_v34 = vpop.f32.mrb[8].mxu0 }
 0x44e   :  { %v552_v35 = vadd.f32 %v889_v33, %v551_v34  ;;  %v1073_v36 = vpop.f32.mrb[9].mxu0 }
 0x44f   :  { %v554_v37 = vpop.f32.mrb[10].mxu0 }
 0x450   :  { %v555_v38 = vadd.f32 %v889_v33, %v554_v37  ;;  %v1074_v39 = vpop.f32.mrb[11].mxu0  ;;  %v558_v40 = vmax.f32 %v552_v35, 0.0 }
 0x452   :  { %v559_v41 = vmax.f32 %v555_v38, 0.0 }
 0x454   :  { %v579_v42 = vpack.c.bf16 %v559_v41, %v558_v40 }
 0x456   :  { %1092 = vmatmul.mubr.bf16.vlgmr.msra.gmra.mrb[8].mxu1 %v579_v42 }
 0x529   :  { %v668_v46 = vpop.f32.mrb[8].mxu1 }
 0x52a   :  { %v669_v47 = vadd.f32 %v915_v45, %v668_v46  ;;  %v1093_v48 = vpop.f32.mrb[9].mxu1 }
 0x52b   :  { %v671_v49 = vpop.f32.mrb[10].mxu1 }
 0x52c   :  { %v672_v50 = vadd.f32 %v915_v45, %v671_v49  ;;  %v1094_v51 = vpop.f32.mrb[11].mxu1  ;;  %v675_v52 = vmax.f32 %v669_v47, 0.0 }
 0x52e   :  { %v676_v53 = vmax.f32 %v672_v50, 0.0 }
 0x530   :  { %v694_v54 = vpack.c.bf16 %v676_v53, %v675_v52 }
 0x532   :  { %1112 = vmatmul.mubr.bf16.vlgmr.msra.gmra.mrb[12].mxu0 %v694_v54 }
 0x605   :  { %v783_v55 = vpop.f32.mrb[12].mxu0 }
 0x606   :  { %v784_v56 = vadd.f32 %v924_v2, %v783_v55  ;;  %v1113_v57 = vpop.f32.mrb[13].mxu0 }
 0x607   :  { %v786_v58 = vpop.f32.mrb[14].mxu0 }
 0x608   :  { %791 = vst.msk [vmem:[#allocation2] sm:$0xff] %vm790_vm3, %v784_v56  ;;  %v787_v59 = vadd.f32 %v924_v2, %v786_v58  ;;  %v1114_v60 = vpop.f32.mrb[15].mxu0 }
 0x60a   :  { %792 = vst.msk [vmem:[#allocation2 + $0x8] sm:$0xff] %vm790_vm3, %v787_v59 }
 0x60b   :  { %1179 = shalt.err (!%p1176_p4)
}
 0x60c   :  { %s1180_s12 = scalar_lea.hbm %s1493_s7, 256 }
 0x60d   :  { %p1181_p5 = scmp.ne.s32.totalorder %s1493_s7, %s1180_s12  ;;  %p1184_p6 = scmp.lt.u32.totalorder %s1180_s12, %s1493_s7 }
 0x60f   :  { %p1186_p7 = pnand %p1184_p6, %p1181_p5 }
 0x611   :  { %1189 = shalt.err (!%p1186_p7)
}
 0x612   :  { %s1195_s17 = smov 128   ;;  %s1196_s18 = smov 8  }
 0x613   :  { %804 = dma.vmem_to_hbm [thread:$0]  %s799_s11, 256, %s1493_s7, [#allocation3], %s1195_s17, %s1195_s17, %s1196_s18  }
 0x614   :  { %1190 = dma.done.wait [#allocation3], 256  }
 0x615   :  { %1191 = vsyncadd [#allocation3], 4294967040 }
 0x616   :  { %808 = vsyncpa [#allocation3], 1 }

</bundles_post_ra>
